<compile_context>
chip_gen: v7x
topology: tpu7x:2x2x1
jax: 0.10.0
libtpu: 0.0.40
codegen_flags: <defaults>
</compile_context>

<pallas_src>
import jax
import jax.numpy as jnp
from jax import lax
from jax.experimental import pallas as pl
from jax.experimental.pallas import tpu as pltpu

_ENC_IN = 5  # pre_box(3) + pooled heightmap(2)


def _round8(n):
    return ((n + 7) // 8) * 8


def _layout(H, box_dim):
    """Static row layout of the fused parameter slab (lane width = 4H)."""
    K = _round8(_ENC_IN + H)          # fused-gate K dim (LHS zero-padded to K)
    row_bgate = K                     # fused gate bias row
    row_wobj = _round8(row_bgate + 1) # object-encoder weight rows start
    row_bobj = row_wobj + box_dim     # object-encoder bias row
    n_rows = _round8(row_bobj + 1)
    return K, row_bgate, row_wobj, row_bobj, n_rows


def strategy_attention_kernel(slab_ref, box_ref, lhs_ref, attn_ref, newhh_ref):
    B, S = attn_ref.shape
    H = newhh_ref.shape[1]
    box_dim = box_ref.shape[1]
    K, row_bgate, row_wobj, row_bobj, _ = _layout(H, box_dim)

    # ---- ObjectEncoder: 1x1 conv over box features == matmul on last dim ----
    # TODO(synk): ObjectEncoder source not provided; modeled as Conv1d(box_dim->H, k=1),
    # so `precedences` is unused.  1/sqrt(H) is folded into these weights offline.
    w_obj = slab_ref[row_wobj:row_wobj + box_dim, 0:H]       # [box_dim, H]
    b_obj = slab_ref[row_bobj:row_bobj + 1, 0:H]             # [1, H]
    keys = (
        jnp.dot(box_ref[...], w_obj, preferred_element_type=jnp.float32) + b_obj
    )  # [B*S, H], already scaled by 1/sqrt(H)

    # ---- fused prebox/heightmap encoder + both GRU gate matmuls: ONE pass ----
    # TODO(synk): HeightmapEncoder source not provided; modeled as global mean-pool
    # (done in the wrapper) + 1x1 conv (2 -> H/2), folded into these gate weights.
    w_gate = slab_ref[0:K, :]                                # [K, 4H]
    b_gate = slab_ref[row_bgate:row_bgate + 1, :]            # [1, 4H]
    lhs = lhs_ref[...]                                       # [B, K]
    gates = (
        jnp.dot(lhs, w_gate, preferred_element_type=jnp.float32) + b_gate
    )  # [B, 4H]  lane-dense (4H == 128)

    r = jax.nn.sigmoid(gates[:, 0:H])
    z = jax.nn.sigmoid(gates[:, H:2 * H])
    i_n = gates[:, 2 * H:3 * H]
    h_n = gates[:, 3 * H:4 * H]
    n = jnp.tanh(i_n + r * h_n)            # i_n / h_n kept separate (GRU semantics)

    h_prev = lhs[:, _ENC_IN:_ENC_IN + H]   # previous hidden state rides in the LHS
    h_new = (1.0 - z) * n + z * h_prev     # [B, H]
    newhh_ref[...] = h_new.astype(newhh_ref.dtype)

    # ---- energy = einsum('nqd,nkd->nqk', query, keys)/sqrt(H), q == 1 ----
    # Unrolled per-batch MXU contraction (contract last dims); S stays lane-dense,
    # no transpose, no XLU cross-lane reduce.  Scale already folded into `keys`.
    rows = []
    for b in range(B):
        e_b = lax.dot_general(
            h_new[b:b + 1, :], keys[b * S:(b + 1) * S, :],
            dimension_numbers=(((1,), (1,)), ((), ())),
            preferred_element_type=jnp.float32,
        )  # [1, S]
        rows.append(e_b)
    attn_ref[...] = jnp.concatenate(rows, axis=0).astype(attn_ref.dtype)


def fuse_params(params, heightmap_width, heightmap_length):
    """Offline weight fusion (run once, outside the hot loop). Returns one slab."""
    del heightmap_width, heightmap_length  # pooling now done in the wrapper
    box_dim, H = params["w_obj"].shape
    half = H // 2
    scale = 1.0 / jnp.sqrt(jnp.float32(H))
    K, row_bgate, row_wobj, row_bobj, n_rows = _layout(H, box_dim)

    # Fold 1/sqrt(H) into the object encoder.
    w_obj_s = params["w_obj"] * scale
    b_obj_s = params["b_obj"] * scale

    # Block-diagonal prebox/heightmap encoder on the pooled 5-wide input.
    w_enc = jnp.zeros((_ENC_IN, H), jnp.float32)
    w_enc = w_enc.at[0:3, 0:half].set(params["w_pre"])
    w_enc = w_enc.at[3:5, half:H].set(params["w_hm"])
    b_enc = jnp.concatenate([params["b_pre"], params["b_hm"]], axis=1)  # [1, H]

    # Fold the encoder into the GRU input-gate weights (gate order r, z, n).
    w_x = [w_enc @ params["w_ih"][g] for g in range(3)]                      # [5, H]
    b_x = [b_enc @ params["w_ih"][g] + params["b_ih"][g] for g in range(3)]  # [1, H]

    # Single [K, 4H] gate weight; LHS columns = [enc_in(5) | h_prev(H) | pad].
    w_gate = jnp.zeros((K, 4 * H), jnp.float32)
    b_gate = jnp.zeros((1, 4 * H), jnp.float32)
    # r: ih and hh rows summed via shared LHS, biases pre-summed.
    w_gate = w_gate.at[0:_ENC_IN, 0:H].set(w_x[0])
    w_gate = w_gate.at[_ENC_IN:_ENC_IN + H, 0:H].set(params["w_hh"][0])
    b_gate = b_gate.at[:, 0:H].set(b_x[0] + params["b_hh"][0])
    # z
    w_gate = w_gate.at[0:_ENC_IN, H:2 * H].set(w_x[1])
    w_gate = w_gate.at[_ENC_IN:_ENC_IN + H, H:2 * H].set(params["w_hh"][1])
    b_gate = b_gate.at[:, H:2 * H].set(b_x[1] + params["b_hh"][1])
    # i_n (hidden-state rows stay zero)
    w_gate = w_gate.at[0:_ENC_IN, 2 * H:3 * H].set(w_x[2])
    b_gate = b_gate.at[:, 2 * H:3 * H].set(b_x[2])
    # h_n (encoder rows stay zero)
    w_gate = w_gate.at[_ENC_IN:_ENC_IN + H, 3 * H:4 * H].set(params["w_hh"][2])
    b_gate = b_gate.at[:, 3 * H:4 * H].set(params["b_hh"][2])

    # One contiguous parameter slab -> a single HBM->VMEM DMA.
    slab = jnp.zeros((n_rows, 4 * H), jnp.float32)
    slab = slab.at[0:K, :].set(w_gate)
    slab = slab.at[row_bgate:row_bgate + 1, :].set(b_gate)
    slab = slab.at[row_wobj:row_wobj + box_dim, 0:H].set(w_obj_s)
    slab = slab.at[row_bobj:row_bobj + 1, 0:H].set(b_obj_s)
    return slab


def strategy_attention_old(box, precedences, pre_box, heightmap, last_hh, slab):
    """Forward pass. `precedences` kept for interface fidelity (unused, see TODO)."""
    del precedences  # TODO(synk): ObjectEncoder source not provided; precedences unused.
    B, S, box_dim = box.shape
    H = last_hh.shape[-1]
    K, _, _, _, _ = _layout(H, box_dim)

    # Layout plumbing outside the kernel (tiny / free XLA ops).
    box2d = box.reshape(B * S, box_dim)
    hm_pool = jnp.mean(heightmap.reshape(B, heightmap.shape[1], -1), axis=-1)  # [B, 2]
    enc_in = jnp.concatenate([pre_box, hm_pool], axis=1)                       # [B, 5]
    lhs = jnp.concatenate(
        [enc_in, last_hh[0], jnp.zeros((B, K - _ENC_IN - H), jnp.float32)],
        axis=1,
    )  # [B, K]

    out_shape = (
        jax.ShapeDtypeStruct((B, S), jnp.float32),
        jax.ShapeDtypeStruct((B, H), jnp.float32),
    )
    vmem = pl.BlockSpec(memory_space=pltpu.MemorySpace.VMEM)
    attn2d, newhh2d = pl.pallas_call(
        strategy_attention_kernel,
        out_shape=out_shape,
        in_specs=[vmem, vmem, vmem],
        out_specs=(vmem, vmem),
    )(slab, box2d, lhs)
    # Restore the torch-facing singleton dims outside the kernel.
    return attn2d[:, None, :], newhh2d[None]


def _reference(box, pre_box, heightmap, last_hh, p):
    """Pure-JAX reference using the original (unfused) parameters."""
    B, S, _ = box.shape
    H = p["w_obj"].shape[1]
    keys = jnp.einsum("bsd,dh->bsh", box, p["w_obj"]) + p["b_obj"]
    pre_vec = pre_box @ p["w_pre"] + p["b_pre"]
    hm_pool = jnp.mean(heightmap.reshape(B, 2, -1), axis=-1)
    height_vec = hm_pool @ p["w_hm"] + p["b_hm"]
    x = jnp.concatenate([pre_vec, height_vec], axis=-1)
    h = last_hh[0]
    r = jax.nn.sigmoid(x @ p["w_ih"][0] + p["b_ih"][0] + h @ p["w_hh"][0] + p["b_hh"][0])
    z = jax.nn.sigmoid(x @ p["w_ih"][1] + p["b_ih"][1] + h @ p["w_hh"][1] + p["b_hh"][1])
    n = jnp.tanh(x @ p["w_ih"][2] + p["b_ih"][2] + r * (h @ p["w_hh"][2] + p["b_hh"][2]))
    h_new = (1.0 - z) * n + z * h
    energy = jnp.einsum("bh,bsh->bs", h_new, keys) / jnp.sqrt(jnp.float32(H))
    return energy[:, None, :], h_new[None]


if __name__ == "__main__":
    B, S, BOX_DIM = 2, 8, 4           # batch, state_num, box_dim
    H = 32                            # hidden_dim
    HALF = H // 2
    HW, HL = 16, 16                   # heightmap_width, heightmap_length

    key = jax.random.PRNGKey(0)
    ks = jax.random.split(key, 16)

    # deterministic synthetic parameters (xavier-ish scale)
    params = {
        "w_obj": 0.1 * jax.random.normal(ks[0], (BOX_DIM, H), jnp.float32),
        "b_obj": 0.1 * jax.random.normal(ks[1], (1, H), jnp.float32),
        "w_pre": 0.1 * jax.random.normal(ks[2], (3, HALF), jnp.float32),
        "b_pre": 0.1 * jax.random.normal(ks[3], (1, HALF), jnp.float32),
        "w_hm": 0.1 * jax.random.normal(ks[4], (2, HALF), jnp.float32),
        "b_hm": 0.1 * jax.random.normal(ks[5], (1, HALF), jnp.float32),
        "w_ih": 0.1 * jax.random.normal(ks[6], (3, H, H), jnp.float32),
        "b_ih": 0.1 * jax.random.normal(ks[7], (3, 1, H), jnp.float32),
        "w_hh": 0.1 * jax.random.normal(ks[8], (3, H, H), jnp.float32),
        "b_hh": 0.1 * jax.random.normal(ks[9], (3, 1, H), jnp.float32),
    }

    box = jax.random.normal(ks[10], (B, S, BOX_DIM), jnp.float32)
    precedences = jax.random.normal(ks[11], (B, S, S), jnp.float32)  # unused (see TODO)
    pre_box = jax.random.normal(ks[12], (B, 3), jnp.float32)
    heightmap = jax.random.normal(ks[13], (B, 2, HW, HL), jnp.float32)
    last_hh = jax.random.normal(ks[14], (1, B, H), jnp.float32)

    slab = fuse_params(params, HW, HL)   # done once, offline

    run = jax.jit(strategy_attention_old)
    attn_vecs, new_hh = run(box, precedences, pre_box, heightmap, last_hh, slab)
    jax.block_until_ready((attn_vecs, new_hh))

    ref_attn, ref_hh = _reference(box, pre_box, heightmap, last_hh, params)
    assert attn_vecs.shape == (B, 1, S) and new_hh.shape == (1, B, H)
    assert jnp.allclose(attn_vecs, ref_attn, atol=1e-4), "attn mismatch"
    assert jnp.allclose(new_hh, ref_hh, atol=1e-4), "hidden mismatch"

    print("KERNEL_OK")
</pallas_src>

<mosaic_0001>
module attributes {stable_mosaic.version = 11 : i64} {
  func.func @strategy_attention_kernel(%arg0: memref<56x128xf32, #tpu.memory_space<vmem>>, %arg1: memref<16x4xf32, #tpu.memory_space<vmem>>, %arg2: memref<2x40xf32, #tpu.memory_space<vmem>>, %arg3: memref<2x8xf32, #tpu.memory_space<vmem>>, %arg4: memref<2x32xf32, #tpu.memory_space<vmem>>) attributes {dimension_semantics = [], scalar_prefetch = 0 : i64, scratch_operands = 0 : i64, tpu.core_type = #tpu.core_type<tc>} {
    %c48 = arith.constant 48 : index
    %c0 = arith.constant 0 : index
    %0 = vector.load %arg0[%c48, %c0] : memref<56x128xf32, #tpu.memory_space<vmem>>, vector<4x32xf32>
    %c52 = arith.constant 52 : index
    %c0_0 = arith.constant 0 : index
    %1 = vector.load %arg0[%c52, %c0_0] : memref<56x128xf32, #tpu.memory_space<vmem>>, vector<1x32xf32>
    %c0_1 = arith.constant 0 : index
    %c0_2 = arith.constant 0 : index
    %2 = vector.load %arg1[%c0_1, %c0_2] : memref<16x4xf32, #tpu.memory_space<vmem>>, vector<16x4xf32>
    %cst = arith.constant dense<0.000000e+00> : vector<16x32xf32>
    %3 = tpu.matmul %2, %0, %cst {dimension_numbers = #tpu.dot_dimension_numbers<[1], [0], [0], [1], [0, 0, 1, 1], [], []>} : vector<16x4xf32>, vector<4x32xf32>, vector<16x32xf32> -> vector<16x32xf32>
    %4 = vector.broadcast %1 : vector<1x32xf32> to vector<16x32xf32>
    %5 = arith.addf %3, %4 : vector<16x32xf32>
    %c0_3 = arith.constant 0 : index
    %c0_4 = arith.constant 0 : index
    %6 = vector.load %arg0[%c0_3, %c0_4] : memref<56x128xf32, #tpu.memory_space<vmem>>, vector<40x128xf32>
    %c40 = arith.constant 40 : index
    %c0_5 = arith.constant 0 : index
    %7 = vector.load %arg0[%c40, %c0_5] : memref<56x128xf32, #tpu.memory_space<vmem>>, vector<1x128xf32>
    %c0_6 = arith.constant 0 : index
    %c0_7 = arith.constant 0 : index
    %8 = vector.load %arg2[%c0_6, %c0_7] : memref<2x40xf32, #tpu.memory_space<vmem>>, vector<2x40xf32>
    %cst_8 = arith.constant dense<0.000000e+00> : vector<2x128xf32>
    %9 = tpu.matmul %8, %6, %cst_8 {dimension_numbers = #tpu.dot_dimension_numbers<[1], [0], [0], [1], [0, 0, 1, 1], [], []>} : vector<2x40xf32>, vector<40x128xf32>, vector<2x128xf32> -> vector<2x128xf32>
    %10 = vector.broadcast %7 : vector<1x128xf32> to vector<2x128xf32>
    %11 = arith.addf %9, %10 : vector<2x128xf32>
    %12 = vector.extract_strided_slice %11 {offsets = [0, 0], sizes = [2, 32], strides = [1, 1]} : vector<2x128xf32> to vector<2x32xf32>
    %13 = arith.negf %12 : vector<2x32xf32>
    %14 = math.exp %13 : vector<2x32xf32>
    %cst_9 = arith.constant 1.000000e+00 : f32
    %15 = vector.broadcast %cst_9 : f32 to vector<2x32xf32>
    %16 = arith.addf %15, %14 : vector<2x32xf32>
    %17 = arith.divf %15, %16 : vector<2x32xf32>
    %18 = vector.extract_strided_slice %11 {offsets = [0, 32], sizes = [2, 32], strides = [1, 1]} : vector<2x128xf32> to vector<2x32xf32>
    %19 = arith.negf %18 : vector<2x32xf32>
    %20 = math.exp %19 : vector<2x32xf32>
    %cst_10 = arith.constant 1.000000e+00 : f32
    %21 = vector.broadcast %cst_10 : f32 to vector<2x32xf32>
    %22 = arith.addf %21, %20 : vector<2x32xf32>
    %23 = arith.divf %21, %22 : vector<2x32xf32>
    %24 = vector.extract_strided_slice %11 {offsets = [0, 64], sizes = [2, 32], strides = [1, 1]} : vector<2x128xf32> to vector<2x32xf32>
    %25 = vector.extract_strided_slice %11 {offsets = [0, 96], sizes = [2, 32], strides = [1, 1]} : vector<2x128xf32> to vector<2x32xf32>
    %26 = arith.mulf %17, %25 : vector<2x32xf32>
    %27 = arith.addf %24, %26 : vector<2x32xf32>
    %28 = math.tanh %27 : vector<2x32xf32>
    %29 = vector.extract_strided_slice %8 {offsets = [0, 5], sizes = [2, 32], strides = [1, 1]} : vector<2x40xf32> to vector<2x32xf32>
    %cst_11 = arith.constant 1.000000e+00 : f32
    %30 = vector.broadcast %cst_11 : f32 to vector<2x32xf32>
    %31 = arith.subf %30, %23 : vector<2x32xf32>
    %32 = arith.mulf %31, %28 : vector<2x32xf32>
    %33 = arith.mulf %23, %29 : vector<2x32xf32>
    %34 = arith.addf %32, %33 : vector<2x32xf32>
    %c0_12 = arith.constant 0 : index
    %c0_13 = arith.constant 0 : index
    %35 = vector.load %arg4[%c0_12, %c0_13] : memref<2x32xf32, #tpu.memory_space<vmem>>, vector<2x32xf32>
    tpu.vector_store %arg4[%c0_12, %c0_13], %34 {strides = array<i32>} : memref<2x32xf32, #tpu.memory_space<vmem>>, vector<2x32xf32>,
    %36 = vector.extract_strided_slice %34 {offsets = [0, 0], sizes = [1, 32], strides = [1, 1]} : vector<2x32xf32> to vector<1x32xf32>
    %37 = vector.extract_strided_slice %5 {offsets = [0, 0], sizes = [8, 32], strides = [1, 1]} : vector<16x32xf32> to vector<8x32xf32>
    %cst_14 = arith.constant dense<0.000000e+00> : vector<1x8xf32>
    %38 = tpu.matmul %36, %37, %cst_14 {dimension_numbers = #tpu.dot_dimension_numbers<[1], [1], [0], [0], [0, 0, 1, 0], [], []>} : vector<1x32xf32>, vector<8x32xf32>, vector<1x8xf32> -> vector<1x8xf32>
    %39 = vector.extract_strided_slice %34 {offsets = [1, 0], sizes = [1, 32], strides = [1, 1]} : vector<2x32xf32> to vector<1x32xf32>
    %40 = vector.extract_strided_slice %5 {offsets = [8, 0], sizes = [8, 32], strides = [1, 1]} : vector<16x32xf32> to vector<8x32xf32>
    %cst_15 = arith.constant dense<0.000000e+00> : vector<1x8xf32>
    %41 = tpu.matmul %39, %40, %cst_15 {dimension_numbers = #tpu.dot_dimension_numbers<[1], [1], [0], [0], [0, 0, 1, 0], [], []>} : vector<1x32xf32>, vector<8x32xf32>, vector<1x8xf32> -> vector<1x8xf32>
    %42 = tpu.concatenate %38, %41 in 0 : vector<1x8xf32>, vector<1x8xf32> -> vector<2x8xf32>
    %c0_16 = arith.constant 0 : index
    %c0_17 = arith.constant 0 : index
    %43 = vector.load %arg3[%c0_16, %c0_17] : memref<2x8xf32, #tpu.memory_space<vmem>>, vector<2x8xf32>
    tpu.vector_store %arg3[%c0_16, %c0_17], %42 {strides = array<i32>} : memref<2x8xf32, #tpu.memory_space<vmem>>, vector<2x8xf32>,
    return
  }
}

</mosaic_0001>

<bundles_post_ra>
// kernel: strategy_attention_old.1
= control target key start
LH: loop header
LB: loop body
LE: loop exit
PB: predicated region body
PF: predicated region fallthrough
CT: control target
= control target key end

     0   :  { %10 = vsyncpa [#allocation3], 0  ;;  %v541_v3 = vmov 0.0|0.0   ;;  %vm542_vm0 = vmmov 0   ;;  %v543_v6 = vmov 0.0   ;;  %s645_s0 = inlined_call_operand.vmem [shape: f32[56,128], index: 0, kind: input, shape index: {}]   ;;  %s646_s1 = inlined_call_operand.vmem [shape: f32[16,4], index: 1, kind: input, shape index: {}]   ;;  %s647_s2 = inlined_call_operand.vmem [shape: f32[2,40], index: 2, kind: input, shape index: {}]   ;;  %s648_s3 = inlined_call_operand.hbm [shape: f32[2,8], index: 3, kind: output, shape index: {0}]   ;;  %s649_s4 = inlined_call_operand.hbm [shape: f32[2,32], index: 4, kind: output, shape index: {1}]  }
   0x1   :  { %v112_v0 = vld [vmem:[%s645_s0] sm:$0xff]  ;;  %v113_v1 = vld [vmem:[%s645_s0 + $0x8] sm:$0xff]  ;;  %v114_v2 = vld [vmem:[%s645_s0 + $0x10] sm:$0xff]  ;;  %472 = vmatprep.subr.bf16.mxu1 %v541_v3  ;;  %459 = vmatprep.mubr.msk.f32.mxu1 %vm542_vm0, %v543_v6 }
   0x2   :  { %v473_v4 = vpack.c.bf16 %v113_v1, %v112_v0  ;;  %v115_v5 = vld [vmem:[%s645_s0 + $0x18] sm:$0xff] }
   0x3   :  { %11 = vsyncpa [#allocation5], 0  ;;  %v476_v7 = vpack.c.bf16 %v115_v5, %v114_v2  ;;  %v116_v8 = vld [vmem:[%s645_s0 + $0x20] sm:$0xff]  ;;  %vm123_vm1 = vcmask 326656   ;;  %v424_v10 = vld [vmem:[%s645_s0 + $0x28] ss:$0 sm:$0xff] }
   0x4   :  { %474 = vmatpush3.bf16.msra.mxu1 %v473_v4  ;;  %v118_v9 = vld [vmem:[%s647_s2] sm:$0x3]  ;;  %s544_s29 = smov 32   ;;  %s545_s2 = smov 64   ;;  %v18_v20 = vld [vmem:[%s645_s0 + $0x30] sm:$0xf] }
   0x5   :  { %475 = vmatprep.subr.bf16.mxu1 %v541_v3  ;;  %vm33_vm2 = vcmask 1043456   ;;  %v20_v21 = vld [vmem:[%s646_s1] sm:$0xff]  ;;  %vm26_vm3 = vcmask 31744   ;;  %v21_v22 = vld [vmem:[%s646_s1 + $0x8] sm:$0xff]  ;;  %s546_s10 = smov 96   ;;  %s547_s11 = smov 27  }
   0x6   :  { %444 = vmatprep.subr.msk.mxu0 %vm33_vm2, %v18_v20  ;;  %446 = vmatprep.mubr.msk.f32.mxu0 %vm26_vm3, %v20_v21  ;;  %v420_v26 = vld [vmem:[%s645_s0 + $0x34] ss:$0 sm:$0xff]  ;;  %vm231_vm4 = vcmask 261120   ;;  %vm229_vm5 = vcmask 254976   ;;  %s548_s0 = smov [#allocation4]  }
   0x7   :  { %445 = vmatpush3.msk.msra.mxu0 %vm33_vm2, %v18_v20  ;;  %s408_s1 = sshll.u32 %s548_s0, 4  ;;  %s409_s1 = int_to_ptr.vmem [resolvable:$true] %s408_s1 }
   0x8   :  { %477 = vmatpush3.bf16.msra.mxu1 %v476_v7  ;;  %447 = vmatmul.mubr.msk.f32.vlgmr.msra.gmra.mrb[0].mxu0 %vm26_vm3, %v21_v22  ;;  %s493_s14 = scalar_lea.vmem %s409_s1, 32  ;;  %p498_p1 = scmp.lt.s32.totalorder %s409_s1, %s409_s1 }
   0x9   :  { %457 = vmatprep.subr.mxu1 %v543_v6  ;;  %462 = vmatprep.subr.mxu0 %v543_v6  ;;  %p494_p0 = scmp.ne.s32.totalorder %s409_s1, %s493_s14  ;;  %p499_p2 = scmp.lt.s32.totalorder %s493_s14, %s493_s14 }
   0xa   :  { %464 = vmatprep.mubr.msk.f32.mxu0 %vm542_vm0, %v543_v6 }
   0xb   :  { %p500_p3 = por %p499_p2, %p498_p1 }
   0xc   :  { %458 = vmatpush3.msra.mxu1 %v116_v8 }
   0xd   :  { %460 = vmatmul.mubr.msk.f32.vlgmr.msra.gmra.mrb[0].mxu1 %vm123_vm1, %v118_v9  ;;  %p501_p4 = pnand %p500_p3, %p494_p0 }
  0xdb   :  { %v448_v27 = vpop.f32.mrb[0].mxu0 }
  0xdc   :  { %v109_v28 = vadd.f32 %v448_v27, %v420_v26  ;;  %v103_v29 = vpop.f32.mrb[1].mxu0 }
  0xdd   :  { %v104_v30 = vadd.f32 %v420_v26, %v103_v29 }
  0xdf   :  { %463 = vmatpush3.xpose.msk.msra.mxu0 %vm231_vm4, %v104_v30 }
  0xe0   :  { %v193_v11 = vpop.f32.mrb[0].mxu1  ;;  %467 = vmatprep.subr.mxu0 %v543_v6 }
  0xe1   :  { %v194_v12 = vadd.f32 %v424_v10, %v193_v11  ;;  %v461_v13 = vpop.f32.mrb[1].mxu1 }
  0xe3   :  { %204 = vrot.lane.b32.xlu0 %v194_v12, %s544_s29  ;;  %v426_v14 = vmul.f32 -1.442695, %v194_v12 }
  0xe5   :  { %487 = vpow2.f32 %v426_v14 }
  0xef   :  { %v488_v15 = vpop.eup %487 }
  0xf0   :  { %v200_v16 = vadd.f32 1.0, %v488_v15 }
  0xf2   :  { %489 = vrcp.f32 %v200_v16 }
  0xfc   :  { %v490_v17 = vpop.eup %489 }
  0xfd   :  { %v214_v32 = vsub.f32 1.0, %v490_v17 }
 0x155   :  { %v205_v18 = vpop.permute.xlu0 %204 }
 0x156   :  { %v207_v19 = vmul.f32 %v490_v17, %v205_v18 }
 0x158   :  { %209 = vrot.lane.b32.xlu0 %v207_v19, %s545_s2 }
 0x1ca   :  { %v210_v23 = vpop.permute.xlu0 %209 }
 0x1cb   :  { %v212_v24 = vadd.f32 %v210_v23, %v194_v12 }
 0x1cd   :  { %491 = vtanh.f32 %v212_v24 }
 0x1d7   :  { %v492_v25 = vpop.eup %491 }
 0x1d8   :  { %216 = vrot.lane.b32.xlu1 %v492_v25, %s546_s10 }
 0x1dc   :  { %220 = vrot.lane.b32.xlu1 %v118_v9, %s547_s11 }
 0x24a   :  { %v217_v31 = vpop.permute.xlu1 %216 }
 0x24b   :  { %v219_v34 = vmul.f32 %v217_v31, %v214_v32 }
 0x24e   :  { %v221_v33 = vpop.permute.xlu1 %220 }
 0x24f   :  { %v223_v35 = vmul.f32 %v490_v17, %v221_v33 }
 0x251   :  { %v224_v36 = vadd.f32 %v223_v35, %v219_v34 }
 0x253   :  { %226 = vrot.lane.b32.xlu0 %v224_v36, %s546_s10  ;;  %v307_v37 = vrot.slane %v224_v36, 1 }
 0x255   :  { %308 = vrot.lane.b32.xlu1 %v307_v37, %s546_s10 }
 0x2c5   :  { %v227_v38 = vpop.permute.xlu0 %226 }
 0x2c6   :  { %230 = vst.msk [vmem:[#allocation4] sm:$0x3] %vm229_vm5, %v227_v38  ;;  %465 = vmatmul.mubr.msk.f32.vlgmr.msra.gmra.mrb[2].mxu0 %vm231_vm4, %v227_v38 }
 0x2c7   :  { %468 = vmatpush3.xpose.msk.msra.mxu0 %vm231_vm4, %v109_v28  ;;  %469 = vmatprep.mubr.msk.f32.mxu0 %vm542_vm0, %v543_v6  ;;  %v309_v39 = vpop.permute.xlu1 %308 }
 0x2ca   :  { %470 = vmatmul.mubr.msk.f32.vlgmr.msra.gmra.mrb[4].mxu0 %vm231_vm4, %v309_v39 }
 0x2cb   :  { %504 = shalt.err (!%p501_p4)
}
 0x2cc   :  { %s505_s17 = scalar_lea.hbm %s649_s4, 32 }
 0x2cd   :  { %p506_p5 = scmp.ne.s32.totalorder %s649_s4, %s505_s17  ;;  %p509_p6 = scmp.lt.u32.totalorder %s505_s17, %s649_s4 }
 0x2cf   :  { %p511_p7 = pnand %p509_p6, %p506_p5 }
 0x2d1   :  { %514 = shalt.err (!%p511_p7)
}
 0x2d2   :  { %411 = dma.vmem_to_hbm [thread:$0]  %s409_s1, 32, %s649_s4, [#allocation5]   ;;  %vm388_vm6 = vcmask 1040384   ;;  %vm390_vm7 = vcmask 58368  }
 0x2d3   :  { %s549_s24 = smov [#allocation2]  }
 0x2d4   :  { %s398_s25 = sshll.u32 %s549_s24, 4  ;;  %s399_s25 = int_to_ptr.vmem [resolvable:$true] %s398_s25 }
 0x2d5   :  { %s515_s26 = scalar_lea.vmem %s399_s25, 32  ;;  %p520_p9 = scmp.lt.s32.totalorder %s399_s25, %s399_s25 }
 0x2d6   :  { %p516_p8 = scmp.ne.s32.totalorder %s399_s25, %s515_s26  ;;  %p521_p10 = scmp.lt.s32.totalorder %s515_s26, %s515_s26 }
 0x2d8   :  { %p522_p11 = por %p521_p10, %p520_p9 }
 0x2da   :  { %p523_p12 = pnand %p522_p11, %p516_p8 }
 0x399   :  { %v303_v40 = vpop.f32.mrb[2].mxu0 }
 0x39a   :  { %v466_v41 = vpop.f32.mrb[3].mxu0 }
 0x39d   :  { %v381_v42 = vpop.f32.mrb[4].mxu0 }
 0x39e   :  { %v386_v43 = vrot.slane %v381_v42, 7  ;;  %v471_v44 = vpop.f32.mrb[5].mxu0 }
 0x3a0   :  { %v389_v45 = vsel %vm388_vm6, %v303_v40, %v386_v43 }
 0x3a1   :  { %391 = vst.msk [vmem:[#allocation2] sm:$0x3] %vm390_vm7, %v389_v45 }
 0x3a2   :  { %526 = shalt.err (!%p523_p12)
}
 0x3a3   :  { %s527_s28 = scalar_lea.hbm %s648_s3, 32 }
 0x3a4   :  { %p528_p13 = scmp.ne.s32.totalorder %s648_s3, %s527_s28  ;;  %p531_p0 = scmp.lt.u32.totalorder %s527_s28, %s648_s3 }
 0x3a6   :  { %p533_p1 = pnand %p531_p0, %p528_p13 }
 0x3a8   :  { %536 = shalt.err (!%p533_p1)
}
 0x3a9   :  { %401 = dma.vmem_to_hbm [thread:$0]  %s399_s25, 32, %s648_s3, [#allocation3]  }
 0x3aa   :  { %537 = dma.done.wait [#allocation3], 32  }
 0x3ab   :  { %538 = vsyncadd [#allocation3], 4294967264 }
 0x3ac   :  { %539 = dma.done.wait [#allocation5], 32  }
 0x3ad   :  { %540 = vsyncadd [#allocation5], 4294967264 }
 0x3ae   :  { %418 = vsyncpa [#allocation3], 1 }
 0x3af   :  { %419 = vsyncpa [#allocation5], 1 }

</bundles_post_ra>
